<compile_context>
chip_gen: v7x
topology: tpu7x:2x2x1
jax: 0.10.0
libtpu: 0.0.40
codegen_flags: <defaults>
</compile_context>

<pallas_src>
import math
import jax
import jax.numpy as jnp
from jax.experimental import pallas as pl
from jax.experimental.pallas import tpu as pltpu


# ----------------------------- Pallas kernel ------------------------------
def _dct_reduce_kernel(x_ref, w_ref, o_ref):
    # x_ref: (tile_nf, tile_cp, HW)   activations (input dtype, upcast here)
    # w_ref: (tile_nf, 1, HW)         f32 compact DCT basis rows
    # o_ref: (1, 1, tile_nf, tile_cp) f32 output block (tile_cp on lanes)
    x = x_ref[...].astype(jnp.float32)          # (tnf, tcp, HW)
    w = w_ref[...]                              # (tnf, 1, HW) broadcasts over tcp
    s = jnp.sum(x * w, axis=-1)                 # (tnf, tcp)  f32 accumulate
    o_ref[...] = s[None, None, :, :]


def _choose_tiles(nf, c_part, hw, budget_elems):
    """Pick (tile_nf, tile_cp): tile_cp divides c_part and is a multiple of 8
    (or the full c_part when c_part is not 8-aligned); if a full c_part row
    block fits the element budget, also tile across frequencies so the grid
    shrinks (fewer pipeline steps)."""
    # --- channel tile ---
    if c_part % 8 == 0:
        max_cp = max(8, (max(1, budget_elems // max(1, hw)) // 8) * 8)
        t = min(c_part, max_cp)
        while t >= 8 and c_part % t != 0:
            t -= 8
        tile_cp = t if t >= 8 else c_part
    else:
        tile_cp = c_part            # full dim (allowed by the (8,128) rule)
    # --- frequency tile ---
    if tile_cp == c_part:
        max_nf = max(1, budget_elems // max(1, c_part * hw))
        t = min(nf, max_nf)
        while t >= 1 and nf % t != 0:
            t -= 1
        tile_nf = max(t, 1)
    else:
        tile_nf = 1
    return tile_nf, tile_cp


def dct_reduce(x3, w3, budget_elems=1 << 20):
    """x3: (nf, c_part, HW) activations; w3: (nf, 1, HW) f32 compact basis.
    Returns (n_nf, n_cp, tile_nf, tile_cp) f32 partial outputs."""
    nf, c_part, hw = x3.shape
    tile_nf, tile_cp = _choose_tiles(nf, c_part, hw, budget_elems)
    assert nf % tile_nf == 0 and c_part % tile_cp == 0
    n_nf = nf // tile_nf
    n_cp = c_part // tile_cp

    out = pl.pallas_call(
        _dct_reduce_kernel,
        out_shape=jax.ShapeDtypeStruct((n_nf, n_cp, tile_nf, tile_cp), jnp.float32),
        grid_spec=pltpu.PrefetchScalarGridSpec(
            num_scalar_prefetch=0,
            grid=(n_nf, n_cp),
            in_specs=[
                pl.BlockSpec((tile_nf, tile_cp, hw), lambda g, j: (g, j, 0)),
                pl.BlockSpec((tile_nf, 1, hw), lambda g, j: (g, 0, 0)),
            ],
            out_specs=pl.BlockSpec((1, 1, tile_nf, tile_cp),
                                   lambda g, j: (g, j, 0, 0)),
        ),
        compiler_params=pltpu.CompilerParams(
            dimension_semantics=("parallel", "parallel"),
            vmem_limit_bytes=32 * 1024 * 1024,
        ),
    )(x3, w3)
    return out, (n_nf, n_cp, tile_nf, tile_cp)


# ------------------------ DCT filter construction -------------------------
def build_dct_filter_table(tile_size):
    """Equivalent of MultiSpectralDCTLayer.build_dct_filter_table."""
    freq = jnp.arange(tile_size, dtype=jnp.float32)[:, None]    # (T, 1)
    pos = jnp.arange(tile_size, dtype=jnp.float32)[None, :]     # (1, T)
    table = jnp.cos(jnp.pi * freq * (pos + 0.5) / tile_size) / math.sqrt(tile_size)
    scale = jnp.where(freq == 0, 1.0, math.sqrt(2.0))            # freq==0: no sqrt(2)
    return table * scale                                         # (T, T)


def compact_dct_weight(dct_table, height, width, mapper_x, mapper_y):
    """Per-frequency (deduplicated) DCT basis: (nf, 1, H*W) float32."""
    mx = jnp.asarray(mapper_x, dtype=jnp.int32)
    my = jnp.asarray(mapper_y, dtype=jnp.int32)
    fx = dct_table[mx][:, :, None]           # (nf, T, 1)
    fy = dct_table[my][:, None, :]           # (nf, 1, T)  (same table, as in torch)
    w = fx * fy                              # (nf, T, T)
    nf = len(mapper_x)
    return w.reshape(nf, 1, height * width).astype(jnp.float32)


# --------------------------- Module wrapper --------------------------------
class MultiSpectralDCTLayerPallas:
    def __init__(self, height):
        self.dct_filters = build_dct_filter_table(height)        # (height, height)
        self._weight_cache = {}                                   # built once per config

    def __call__(self, x, height, width, mapper_x, mapper_y, channels,
                 budget_elems=1 << 20):
        assert x.ndim == 3, f"x must be 3 dimensions, got {x.ndim}"
        assert len(mapper_x) == len(mapper_y)
        assert channels % len(mapper_x) == 0
        assert x.shape[0] == channels, "x channel dim must match `channels`"
        assert x.shape[1] == height and x.shape[2] == width
        # Original torch module builds its DCT table from `height` only and uses
        # it for both axes -> only square tiles are well-defined.
        assert height == width, "torch module's DCT table is square (height only)"

        nf = len(mapper_x)
        c_part = channels // nf

        key = (height, width, tuple(int(v) for v in mapper_x),
               tuple(int(v) for v in mapper_y))
        w3 = self._weight_cache.get(key)
        if w3 is None:
            w3 = compact_dct_weight(self.dct_filters, height, width,
                                    mapper_x, mapper_y)           # (nf, 1, HW)
            self._weight_cache[key] = w3

        # Group channels by frequency; keep the input dtype across the DMA
        # (bf16 stays bf16), the kernel upcasts to f32 for the accumulate.
        x3 = x.reshape(nf, c_part, height * width)
        out, _ = dct_reduce(x3, w3, budget_elems)   # (n_nf, n_cp, tile_nf, tile_cp)
        # (a, j, b, k) -> (a, b, j, k) -> channel = (a*tile_nf+b)*c_part + j*tile_cp + k
        return jnp.transpose(out, (0, 2, 1, 3)).reshape(channels)


# ------------------------------- Reference ---------------------------------
def reference(x, height, width, mapper_x, mapper_y, channels, dct_table):
    c_part = channels // len(mapper_x)
    mx = jnp.asarray(mapper_x, dtype=jnp.int32)
    my = jnp.asarray(mapper_y, dtype=jnp.int32)
    fx = dct_table[mx][:, :, None]
    fy = dct_table[my][:, None, :]
    weight = jnp.repeat(fx * fy, c_part, axis=0).reshape(channels, height, width)
    return jnp.sum(x.astype(jnp.float32) * weight, axis=(1, 2))


if __name__ == "__main__":
    key = jax.random.PRNGKey(0)

    # Case 1: tiny FcaNet-style config (c_part not a multiple of 8 -> full tile)
    channels, height, width = 4, 16, 16
    mapper_x = [0, 1]
    mapper_y = [0, 1]
    x = jax.random.normal(key, (channels, height, width), dtype=jnp.float32)

    layer = MultiSpectralDCTLayerPallas(height)
    out = jax.block_until_ready(layer(x, height, width, mapper_x, mapper_y, channels))
    ref = reference(x, height, width, mapper_x, mapper_y, channels, layer.dct_filters)
    assert out.shape == (channels,)
    assert jnp.allclose(out, ref, atol=1e-4, rtol=1e-4), (out, ref)

    # Case 2: c_part multiple of 8 (8-aligned channel tile, all freqs in one block)
    channels2, height2, width2 = 32, 8, 8
    mapper_x2 = [0, 1, 2, 3]
    mapper_y2 = [0, 2, 1, 3]
    x2 = jax.random.normal(jax.random.PRNGKey(1),
                           (channels2, height2, width2), dtype=jnp.float32)

    layer2 = MultiSpectralDCTLayerPallas(height2)
    out2 = jax.block_until_ready(
        layer2(x2, height2, width2, mapper_x2, mapper_y2, channels2))
    ref2 = reference(x2, height2, width2, mapper_x2, mapper_y2, channels2,
                     layer2.dct_filters)
    assert out2.shape == (channels2,)
    assert jnp.allclose(out2, ref2, atol=1e-4, rtol=1e-4), (out2, ref2)

    # Case 3: force a multi-step grid (small element budget) to exercise the
    # tiled (n_nf > 1, n_cp > 1) pipeline path, bf16 activations.
    channels3, height3, width3 = 64, 16, 16
    mapper_x3 = [0, 1, 2, 3]
    mapper_y3 = [0, 3, 1, 2]
    x3 = jax.random.normal(jax.random.PRNGKey(2),
                           (channels3, height3, width3)).astype(jnp.bfloat16)

    layer3 = MultiSpectralDCTLayerPallas(height3)
    out3 = jax.block_until_ready(
        layer3(x3, height3, width3, mapper_x3, mapper_y3, channels3,
               budget_elems=8 * height3 * width3))   # tile_cp=8, tile_nf=1
    ref3 = reference(x3, height3, width3, mapper_x3, mapper_y3, channels3,
                     layer3.dct_filters)
    assert out3.shape == (channels3,)
    assert jnp.allclose(out3, ref3, atol=2e-2, rtol=2e-2), (out3, ref3)

    print("KERNEL_OK")
</pallas_src>

<mosaic_0001>
module attributes {stable_mosaic.version = 11 : i64} {
  func.func @_dct_reduce_kernel(%arg0: i32, %arg1: i32, %arg2: memref<2x2x256xf32, #tpu.memory_space<vmem>>, %arg3: memref<2x1x256xf32, #tpu.memory_space<vmem>>, %arg4: memref<1x1x2x2xf32, #tpu.memory_space<vmem>>) attributes {dimension_semantics = [#tpu.dimension_semantics<parallel>, #tpu.dimension_semantics<parallel>], iteration_bounds = array<i64: 1, 1>, scalar_prefetch = 0 : i64, scratch_operands = 0 : i64, tpu.core_type = #tpu.core_type<tc>, window_params = [{transform_indices = @transform_0, window_bounds = array<i64: 2, 2, 256>}, {transform_indices = @transform_1, window_bounds = array<i64: 2, 1, 256>}, {transform_indices = @transform_2, window_bounds = array<i64: 1, 1, 2, 2>}]} {
    %c0 = arith.constant 0 : index
    %c0_0 = arith.constant 0 : index
    %c0_1 = arith.constant 0 : index
    %0 = vector.load %arg2[%c0, %c0_0, %c0_1] : memref<2x2x256xf32, #tpu.memory_space<vmem>>, vector<2x2x256xf32>
    %c0_2 = arith.constant 0 : index
    %c0_3 = arith.constant 0 : index
    %c0_4 = arith.constant 0 : index
    %1 = vector.load %arg3[%c0_2, %c0_3, %c0_4] : memref<2x1x256xf32, #tpu.memory_space<vmem>>, vector<2x1x256xf32>
    %2 = vector.broadcast %1 : vector<2x1x256xf32> to vector<2x2x256xf32>
    %3 = arith.mulf %0, %2 : vector<2x2x256xf32>
    %cst = arith.constant dense<0.000000e+00> : vector<2x2xf32>
    %4 = vector.multi_reduction <add>, %3, %cst [2] : vector<2x2x256xf32> to vector<2x2xf32>
    %5 = vector.shape_cast %4 : vector<2x2xf32> to vector<1x1x2x2xf32>
    %c0_5 = arith.constant 0 : index
    %c0_6 = arith.constant 0 : index
    %c0_7 = arith.constant 0 : index
    %c0_8 = arith.constant 0 : index
    %6 = vector.load %arg4[%c0_5, %c0_6, %c0_7, %c0_8] : memref<1x1x2x2xf32, #tpu.memory_space<vmem>>, vector<1x1x2x2xf32>
    tpu.vector_store %arg4[%c0_5, %c0_6, %c0_7, %c0_8], %5 {strides = array<i32>} : memref<1x1x2x2xf32, #tpu.memory_space<vmem>>, vector<1x1x2x2xf32>,
    return
  }
  func.func @transform_0(%arg0: i32, %arg1: i32) -> (i32, i32, i32) {
    %c0_i32 = arith.constant 0 : i32
    %c0_i32_0 = arith.constant 0 : i32
    return %arg0, %arg1, %c0_i32 : i32, i32, i32
  }
  func.func @transform_1(%arg0: i32, %arg1: i32) -> (i32, i32, i32) {
    %c0_i32 = arith.constant 0 : i32
    %c0_i32_0 = arith.constant 0 : i32
    %c0_i32_1 = arith.constant 0 : i32
    return %arg0, %c0_i32, %c0_i32_0 : i32, i32, i32
  }
  func.func @transform_2(%arg0: i32, %arg1: i32) -> (i32, i32, i32, i32) {
    %c0_i32 = arith.constant 0 : i32
    %c0_i32_0 = arith.constant 0 : i32
    %c0_i32_1 = arith.constant 0 : i32
    return %arg0, %arg1, %c0_i32, %c0_i32_0 : i32, i32, i32, i32
  }
}

</mosaic_0001>

<bundles_post_ra>
// kernel: tpu_custom_call.1
= control target key start
LH: loop header
LB: loop body
LE: loop exit
PB: predicated region body
PF: predicated region fallthrough
CT: control target
= control target key end

     0   :  { %7 = vsyncpa [#allocation3], 0  ;;  %s287_s0 = inlined_call_operand.hbm [shape: f32[2,2,256], index: 0, kind: input, shape index: {}]   ;;  %s288_s1 = inlined_call_operand.hbm [shape: f32[2,1,256], index: 1, kind: input, shape index: {}]   ;;  %s289_s2 = inlined_call_operand.hbm [shape: f32[1,1,2,2], index: 2, kind: output, shape index: {}]  }
   0x1   :  { %8 = vsyncpa [#allocation6], 0 }
   0x2   :  { %9 = vsyncpa [#allocation4], 0  ;;  %s228_s9 = smov [#allocation2]   ;;  %s156_s13 = scalar_lea.hbm %s287_s0, 128 }
   0x3   :  { %s15_s10 = sshll.u32 %s228_s9, 4  ;;  %p157_p0 = scmp.ne.s32.totalorder %s287_s0, %s156_s13  ;;  %s16_s10 = int_to_ptr.vmem [resolvable:$true] %s15_s10 }
   0x4   :  { %p160_p1 = scmp.lt.u32.totalorder %s156_s13, %s287_s0 }
   0x6   :  { %p162_p2 = pnand %p160_p1, %p157_p0 }
   0x8   :  { %165 = shalt.err (!%p162_p2)
}
   0x9   :  { %s166_s18 = scalar_lea.vmem %s16_s10, 128  ;;  %p171_p4 = scmp.lt.s32.totalorder %s16_s10, %s16_s10 }
   0xa   :  { %p167_p3 = scmp.ne.s32.totalorder %s16_s10, %s166_s18  ;;  %p172_p5 = scmp.lt.s32.totalorder %s166_s18, %s166_s18 }
   0xc   :  { %p173_p6 = por %p172_p5, %p171_p4 }
   0xe   :  { %p174_p7 = pnand %p173_p6, %p167_p3 }
  0x10   :  { %177 = shalt.err (!%p174_p7)
}
  0x11   :  { %s229_s19 = smov 64   ;;  %s230_s20 = smov 4  }
  0x12   :  { %21 = dma.hbm_to_vmem [thread:$0]  %s287_s0, 128, %s16_s10, [#allocation3], %s229_s19, %s229_s19, %s230_s20  }
  0x13   :  { %s231_s23 = smov [#allocation5]   ;;  %s178_s27 = scalar_lea.hbm %s288_s1, 64 }
  0x14   :  { %s27_s24 = sshll.u32 %s231_s23, 4  ;;  %p179_p8 = scmp.ne.s32.totalorder %s288_s1, %s178_s27  ;;  %s28_s24 = int_to_ptr.vmem [resolvable:$true] %s27_s24 }
  0x15   :  { %p182_p9 = scmp.lt.u32.totalorder %s178_s27, %s288_s1 }
  0x17   :  { %p184_p10 = pnand %p182_p9, %p179_p8 }
  0x19   :  { %187 = shalt.err (!%p184_p10)
}
  0x1a   :  { %s188_s4 = scalar_lea.vmem %s28_s24, 64  ;;  %p193_p12 = scmp.lt.s32.totalorder %s28_s24, %s28_s24 }
  0x1b   :  { %p189_p11 = scmp.ne.s32.totalorder %s28_s24, %s188_s4  ;;  %p194_p13 = scmp.lt.s32.totalorder %s188_s4, %s188_s4 }
  0x1d   :  { %p195_p0 = por %p194_p13, %p193_p12 }
  0x1f   :  { %p196_p1 = pnand %p195_p0, %p189_p11 }
  0x21   :  { %199 = shalt.err (!%p196_p1)
}
  0x22   :  { %s232_s0 = smov 32   ;;  %s233_s5 = smov 2  }
  0x23   :  { %33 = dma.hbm_to_vmem [thread:$0]  %s288_s1, 64, %s28_s24, [#allocation6], %s232_s0, %s232_s0, %s233_s5  }
  0x24   :  { %222 = dma.done.wait [#allocation3], 128  }
  0x25   :  { %223 = vsyncadd [#allocation3], 4294967168 }
  0x26   :  { %224 = dma.done.wait [#allocation6], 64  }
  0x27   :  { %225 = vsyncadd [#allocation6], 4294967232  ;;  %v46_v0 = vlaneseq  ;;  %v234_v1 = vmov 1983009808   ;;  %v42_v9 = vld [vmem:[#allocation5] sm:$0x3] }
  0x28   :  { %v64_v2 = vunpack.c.l.s4 %v234_v1  ;;  %v43_v13 = vld [vmem:[#allocation5 + $0x2] sm:$0x3]  ;;  %v40_v17 = vld [vmem:[#allocation2] sm:$0xf]  ;;  %v41_v20 = vld [vmem:[#allocation2 + $0x4] sm:$0xf] }
  0x29   :  { %v47_v3 = vshrl.u32 %v46_v0, 7  ;;  %v118_v4 = vand.u32 127, %v46_v0  ;;  %vm104_vm0 = vcmask 1041408   ;;  %s235_s1 = smov [#allocation7]   ;;  %vm127_vm1 = vcmask 1041409  }
  0x2a   :  { %v65_v7 = vunpack.c.0.s8 %v64_v2  ;;  %s138_s8 = sshll.u32 %s235_s1, 4  ;;  %vm130_vm2 = vcmask 9216   ;;  %s139_s8 = int_to_ptr.vmem [resolvable:$true] %s138_s8 }
  0x2b   :  { %v48_v5 = vsub.s32 0, %v47_v3  ;;  %v52_v6 = vsub.s32 1, %v47_v3  ;;  %v121_v8 = vsub.s32 %v118_v4, %v47_v3  ;;  %s200_s9 = scalar_lea.vmem %s139_s8, 32  ;;  %p205_p3 = scmp.lt.s32.totalorder %s139_s8, %s139_s8 }
  0x2c   :  { %v68_v12 = vsub.s32 %v65_v7, %v47_v3  ;;  %p201_p2 = scmp.ne.s32.totalorder %s139_s8, %s200_s9  ;;  %p206_p4 = scmp.lt.s32.totalorder %s200_s9, %s200_s9 }
  0x2d   :  { %v49_v10 = vrot.slane %v42_v9, %v48_v5  ;;  %v53_v11 = vrot.slane %v42_v9, %v52_v6  ;;  %v57_v14 = vrot.slane %v43_v13, %v48_v5  ;;  %v61_v15 = vrot.slane %v43_v13, %v52_v6 }
  0x2e   :  { %p207_p5 = por %p206_p4, %p205_p3 }
  0x2f   :  { %v62_v16 = vcombine.low %v49_v10, %v53_v11  ;;  %v70_v18 = vcombine.low %v57_v14, %v61_v15 }
  0x30   :  { %p208_p6 = pnand %p207_p5, %p201_p2 }
  0x31   :  { %v69_v19 = vrot.slane %v62_v16, %v68_v12  ;;  %v77_v21 = vrot.slane %v70_v18, %v68_v12 }
  0x33   :  { %v80_v22 = vmul.f32 %v69_v19, %v40_v17  ;;  %v81_v23 = vmul.f32 %v77_v21, %v41_v20 }
  0x35   :  { %v90_v24 = vrot.slane %v80_v22, %v68_v12  ;;  %v98_v25 = vrot.slane %v81_v23, %v68_v12 }
  0x37   :  { %v91_v26 = vcombine.high %v90_v24, %v90_v24  ;;  %v105_v27 = vsel %vm104_vm0, %v90_v24, 0.0  ;;  %v99_v28 = vcombine.high %v98_v25, %v98_v25  ;;  %v110_v30 = vsel %vm104_vm0, %v98_v25, 0.0 }
  0x39   :  { %v106_v29 = vsel %vm104_vm0, %v91_v26, 0.0  ;;  %v111_v32 = vsel %vm104_vm0, %v99_v28, 0.0 }
  0x3a   :  { %v107_v31 = vadd.f32 %v106_v29, %v105_v27  ;;  %v112_v33 = vadd.f32 %v111_v32, %v110_v30 }
  0x3c   :  { %108 = vadd.xlane.f32.xlu0 %v107_v31 }
  0x40   :  { %113 = vadd.xlane.f32.xlu0 %v112_v33 }
  0xc9   :  { %v109_v34 = vpop.xlane.xlu0 %108 }
  0xca   :  { %v122_v36 = vrot.slane %v109_v34, %v121_v8 }
  0xcd   :  { %v114_v35 = vpop.xlane.xlu0 %113 }
  0xce   :  { %v126_v37 = vrot.slane %v114_v35, %v121_v8 }
  0xd0   :  { %v128_v38 = vsel %vm127_vm1, %v126_v37, %v122_v36 }
  0xd1   :  { %131 = vst.msk [vmem:[#allocation7] sm:$0x3] %vm130_vm2, %v128_v38 }
  0xd2   :  { %211 = shalt.err (!%p208_p6)
}
  0xd3   :  { %s212_s12 = scalar_lea.hbm %s289_s2, 32 }
  0xd4   :  { %p213_p7 = scmp.ne.s32.totalorder %s289_s2, %s212_s12  ;;  %p216_p8 = scmp.lt.u32.totalorder %s212_s12, %s289_s2 }
  0xd6   :  { %p218_p9 = pnand %p216_p8, %p213_p7 }
  0xd8   :  { %221 = shalt.err (!%p218_p9)
}
  0xd9   :  { %141 = dma.vmem_to_hbm [thread:$0]  %s139_s8, 32, %s289_s2, [#allocation4]  }
  0xda   :  { %226 = dma.done.wait [#allocation4], 32  }
  0xdb   :  { %227 = vsyncadd [#allocation4], 4294967264 }
  0xdc   :  { %145 = vsyncpa [#allocation3], 1 }
  0xdd   :  { %146 = vsyncpa [#allocation6], 1 }
  0xde   :  { %147 = vsyncpa [#allocation4], 1 }

</bundles_post_ra>
